<compile_context>
chip_gen: v5e
topology: v5e:2x2
jax: 0.10.0
libtpu: 0.0.40
codegen_flags: <defaults>
</compile_context>

<pallas_src>
import jax
import jax.numpy as jnp
from jax.experimental import pallas as pl
from jax.experimental.pallas import tpu as pltpu


def _round_up(x: int, m: int) -> int:
    return ((x + m - 1) // m) * m


def embed_data_kernel(idx_ref, w_ref, out_ref):
    """One grid step over TILE_NP packed row-pairs.

    idx_ref: (TILE_NP, 8) int32. Cols 0..3 = offset vocab ids of row 2k,
             cols 4..7 = offset ids of row 2k+1 shifted by +V_pad.
             Padding rows hold -1 (matches nothing -> zero one-hot row).
    w_ref:   (2*V_pad, 2*D) fused block-diagonal table (VMEM resident),
             with the ObjectEmbed Linear weight AND bias folded in.
    out_ref: (TILE_NP, 2*D) packed output: row k = [out[2k], out[2k+1]].
    """
    idxp = idx_ref[...]                                   # (TILE_NP, 8)
    tile_np = idxp.shape[0]
    k2 = w_ref.shape[0]                                   # 2 * V_pad
    iota = jax.lax.broadcasted_iota(jnp.int32, (tile_np, k2), 1)

    # Combined one-hot over 8 disjoint vocab segments: bool compares merged
    # with a pairwise OR tree (depth 3), single cast at the end.
    cmps = [idxp[:, c:c + 1] == iota for c in range(idxp.shape[1])]
    while len(cmps) > 1:
        cmps = [jnp.logical_or(cmps[i], cmps[i + 1])
                for i in range(0, len(cmps), 2)]
    onehot = cmps[0].astype(w_ref.dtype)

    acc = jnp.dot(onehot, w_ref[...], preferred_element_type=jnp.float32)
    out_ref[...] = acc.astype(out_ref.dtype)


def prepare_fused_params(subj_table, ev_table, ot_table, od_table,
                         red_w, red_b, table_dtype=jnp.bfloat16):
    """Host-side constant folding (do once per parameter set).

    red_w is the ObjectEmbed Linear weight pre-transposed to
    (embedding_dim, out_dim), so the reduction is `emb @ red_w + red_b`.
    The bias is baked into every objectData row of the fused table.
    Returns (fused_w, offsets, v_pad, d_total).
    """
    od_reduced = (jnp.dot(od_table.astype(jnp.float32),
                          red_w.astype(jnp.float32))
                  + red_b.astype(jnp.float32)[None, :])    # fold Linear + bias
    tables = [subj_table, ev_table, ot_table, od_reduced]
    vocabs = [int(t.shape[0]) for t in tables]
    dims = [int(t.shape[1]) for t in tables]
    v_total, d_total = sum(vocabs), sum(dims)
    v_pad = _round_up(v_total, 64)        # one-hot width 2*v_pad is lane-dense

    # Block-diagonal table: row segment c holds table c in column segment c
    # (column order == torch.cat order).
    w_bd = jnp.zeros((v_pad, d_total), jnp.float32)
    r = c = 0
    for t in tables:
        w_bd = w_bd.at[r:r + t.shape[0], c:c + t.shape[1]].set(
            t.astype(jnp.float32))
        r += int(t.shape[0])
        c += int(t.shape[1])

    # Pack 2 logical rows per kernel row -> duplicate the block-diagonal.
    w2 = jnp.zeros((2 * v_pad, 2 * d_total), jnp.float32)
    w2 = w2.at[:v_pad, :d_total].set(w_bd)
    w2 = w2.at[v_pad:, d_total:].set(w_bd)

    offs, acc_v = [], 0
    for v in vocabs:
        offs.append(acc_v)
        acc_v += v
    offsets = jnp.array(offs, jnp.int32)

    return w2.astype(table_dtype), offsets, v_pad, d_total


def embed_data(idx, fused_w, offsets, v_pad, d_total, *, tile_np=2048,
               out_dtype=jnp.float32):
    """idx: int [B, S, 4]. Returns out_dtype [B, S, d_total]."""
    B, S, F = idx.shape
    N = B * S
    NP = -(-N // 2)                                         # row pairs

    # Keep >= 2 grid steps whenever possible (v7x megacore), tile mult of 8.
    half = max(8, _round_up(-(-NP // 2), 8))
    tile_np = max(8, min(tile_np, half))
    np_pad = _round_up(NP, tile_np)
    n_pad = 2 * np_pad

    # Bake vocab offsets (and the +v_pad shift for odd rows) into the ids.
    idx_off = idx.reshape(N, F).astype(jnp.int32) + offsets[None, :]
    idx_off = idx_off + (jnp.arange(N, dtype=jnp.int32)[:, None] % 2) * v_pad
    idx_padded = jnp.full((n_pad, F), -1, jnp.int32).at[:N].set(idx_off)
    idx_pairs = idx_padded.reshape(np_pad, 2 * F)           # (NP_pad, 8)

    k2, d2 = fused_w.shape                                  # (2*v_pad, 2*d_total)
    grid = (np_pad // tile_np,)

    cost = pl.CostEstimate(
        flops=2 * np_pad * k2 * d2,
        transcendentals=0,
        bytes_accessed=(idx_pairs.size * 4
                        + fused_w.size * fused_w.dtype.itemsize
                        + np_pad * d2 * jnp.dtype(out_dtype).itemsize),
    )

    out = pl.pallas_call(
        embed_data_kernel,
        out_shape=jax.ShapeDtypeStruct((np_pad, d2), out_dtype),
        grid=grid,
        in_specs=[
            pl.BlockSpec((tile_np, 2 * F), lambda i: (i, 0)),   # streamed
            pl.BlockSpec((k2, d2), lambda i: (0, 0)),           # VMEM resident
        ],
        out_specs=pl.BlockSpec((tile_np, d2), lambda i: (i, 0)),
        compiler_params=pltpu.CompilerParams(
            dimension_semantics=("parallel",)),
        cost_estimate=cost,
    )(idx_pairs, fused_w)

    # (np_pad, 2*D) and (n_pad, D) share the same row-major layout -> free.
    return out.reshape(n_pad, d_total)[:N].reshape(B, S, d_total)


def reference(idx, subj_table, ev_table, ot_table, od_table, red_w, red_b):
    subj = subj_table[idx[:, :, 0]]
    ev = ev_table[idx[:, :, 1]]
    ot = ot_table[idx[:, :, 2]]
    od = od_table[idx[:, :, 3]] @ red_w + red_b
    return jnp.concatenate([subj, ev, ot, od], axis=-1)


if __name__ == "__main__":
    # Synthetic config (mirrors EmbedData.__init__ shapes).
    input_sizes = {"subject": 16, "event": 12, "objectType": 10,
                   "objectData": 24}            # vocab sizes
    embedding_dims = {"subject": 16, "event": 8, "objectType": 8,
                      "objectData": 32}         # output dims per feature
    pretrained_dim = 64                         # ObjectEmbed embedding_dim
    B, S = 2, 8

    key = jax.random.PRNGKey(0)
    keys = jax.random.split(key, 10)

    subj_table = jax.random.normal(
        keys[0], (input_sizes["subject"], embedding_dims["subject"]),
        jnp.float32)
    ev_table = jax.random.normal(
        keys[1], (input_sizes["event"], embedding_dims["event"]), jnp.float32)
    ot_table = jax.random.normal(
        keys[2], (input_sizes["objectType"], embedding_dims["objectType"]),
        jnp.float32)
    od_table = jax.random.normal(
        keys[3], (input_sizes["objectData"], pretrained_dim), jnp.float32)
    # nn.Linear(pretrained_dim, out_dim): weight [out, in] -> pass transposed.
    red_w = jax.random.normal(
        keys[4], (pretrained_dim, embedding_dims["objectData"]),
        jnp.float32) * 0.1
    red_b = jax.random.normal(
        keys[5], (embedding_dims["objectData"],), jnp.float32) * 0.1

    idx = jnp.stack([
        jax.random.randint(keys[6], (B, S), 0, input_sizes["subject"]),
        jax.random.randint(keys[7], (B, S), 0, input_sizes["event"]),
        jax.random.randint(keys[8], (B, S), 0, input_sizes["objectType"]),
        jax.random.randint(keys[9], (B, S), 0, input_sizes["objectData"]),
    ], axis=-1).astype(jnp.int32)  # [B, S, 4]

    ref = reference(idx, subj_table, ev_table, ot_table, od_table,
                    red_w, red_b)
    d_expect = sum(embedding_dims.values())

    # 1) f32 table path: bit-parity check against the f32 reference.
    fw32, offsets, v_pad, d_total = prepare_fused_params(
        subj_table, ev_table, ot_table, od_table, red_w, red_b,
        table_dtype=jnp.float32)
    out32 = jax.block_until_ready(
        embed_data(idx, fw32, offsets, v_pad, d_total))
    assert out32.shape == (B, S, d_expect)
    assert jnp.allclose(out32, ref, atol=1e-5, rtol=1e-5), \
        float(jnp.max(jnp.abs(out32 - ref)))

    # 2) bf16 table path (default, fast on v5e/v6e/v7x MXU): looser tolerance,
    #    since the table values round to bf16 (one-hot + f32 accum are exact).
    fwbf, offsets, v_pad, d_total = prepare_fused_params(
        subj_table, ev_table, ot_table, od_table, red_w, red_b,
        table_dtype=jnp.bfloat16)
    outbf = jax.block_until_ready(
        embed_data(idx, fwbf, offsets, v_pad, d_total))
    assert outbf.shape == (B, S, d_expect)
    assert jnp.allclose(outbf, ref, atol=3e-2, rtol=3e-2), \
        float(jnp.max(jnp.abs(outbf - ref)))

    print("KERNEL_OK")
</pallas_src>

<mosaic_0001>
module attributes {stable_mosaic.version = 11 : i64} {
  func.func @embed_data_kernel(%arg0: i32, %arg1: memref<8x8xi32, #tpu.memory_space<vmem>>, %arg2: memref<128x128xf32, #tpu.memory_space<vmem>>, %arg3: memref<8x128xf32, #tpu.memory_space<vmem>>) attributes {dimension_semantics = [#tpu.dimension_semantics<parallel>], iteration_bounds = array<i64: 1>, scalar_prefetch = 0 : i64, scratch_operands = 0 : i64, tpu.core_type = #tpu.core_type<tc>, window_params = [{transform_indices = @transform_0, window_bounds = array<i64: 8, 8>}, {pipeline_mode = #tpu.pipeline_mode<synchronous>, transform_indices = @transform_1, window_bounds = array<i64: 128, 128>}, {transform_indices = @transform_2, window_bounds = array<i64: 8, 128>}]} {
    %c0 = arith.constant 0 : index
    %c0_0 = arith.constant 0 : index
    %0 = vector.load %arg1[%c0, %c0_0] : memref<8x8xi32, #tpu.memory_space<vmem>>, vector<8x8xi32>
    %1 = tpu.iota {dimensions = array<i32: 1>} : vector<8x128xi32>
    %2 = vector.extract_strided_slice %0 {offsets = [0, 0], sizes = [8, 1], strides = [1, 1]} : vector<8x8xi32> to vector<8x1xi32>
    %3 = vector.broadcast %2 : vector<8x1xi32> to vector<8x128xi32>
    %4 = arith.cmpi eq, %3, %1 : vector<8x128xi32>
    %5 = vector.extract_strided_slice %0 {offsets = [0, 1], sizes = [8, 1], strides = [1, 1]} : vector<8x8xi32> to vector<8x1xi32>
    %6 = vector.broadcast %5 : vector<8x1xi32> to vector<8x128xi32>
    %7 = arith.cmpi eq, %6, %1 : vector<8x128xi32>
    %8 = vector.extract_strided_slice %0 {offsets = [0, 2], sizes = [8, 1], strides = [1, 1]} : vector<8x8xi32> to vector<8x1xi32>
    %9 = vector.broadcast %8 : vector<8x1xi32> to vector<8x128xi32>
    %10 = arith.cmpi eq, %9, %1 : vector<8x128xi32>
    %11 = vector.extract_strided_slice %0 {offsets = [0, 3], sizes = [8, 1], strides = [1, 1]} : vector<8x8xi32> to vector<8x1xi32>
    %12 = vector.broadcast %11 : vector<8x1xi32> to vector<8x128xi32>
    %13 = arith.cmpi eq, %12, %1 : vector<8x128xi32>
    %14 = vector.extract_strided_slice %0 {offsets = [0, 4], sizes = [8, 1], strides = [1, 1]} : vector<8x8xi32> to vector<8x1xi32>
    %15 = vector.broadcast %14 : vector<8x1xi32> to vector<8x128xi32>
    %16 = arith.cmpi eq, %15, %1 : vector<8x128xi32>
    %17 = vector.extract_strided_slice %0 {offsets = [0, 5], sizes = [8, 1], strides = [1, 1]} : vector<8x8xi32> to vector<8x1xi32>
    %18 = vector.broadcast %17 : vector<8x1xi32> to vector<8x128xi32>
    %19 = arith.cmpi eq, %18, %1 : vector<8x128xi32>
    %20 = vector.extract_strided_slice %0 {offsets = [0, 6], sizes = [8, 1], strides = [1, 1]} : vector<8x8xi32> to vector<8x1xi32>
    %21 = vector.broadcast %20 : vector<8x1xi32> to vector<8x128xi32>
    %22 = arith.cmpi eq, %21, %1 : vector<8x128xi32>
    %23 = vector.extract_strided_slice %0 {offsets = [0, 7], sizes = [8, 1], strides = [1, 1]} : vector<8x8xi32> to vector<8x1xi32>
    %24 = vector.broadcast %23 : vector<8x1xi32> to vector<8x128xi32>
    %25 = arith.cmpi eq, %24, %1 : vector<8x128xi32>
    %26 = arith.ori %4, %7 : vector<8x128xi1>
    %27 = arith.ori %10, %13 : vector<8x128xi1>
    %28 = arith.ori %16, %19 : vector<8x128xi1>
    %29 = arith.ori %22, %25 : vector<8x128xi1>
    %30 = arith.ori %26, %27 : vector<8x128xi1>
    %31 = arith.ori %28, %29 : vector<8x128xi1>
    %32 = arith.ori %30, %31 : vector<8x128xi1>
    %33 = arith.extui %32 : vector<8x128xi1> to vector<8x128xi32>
    %34 = arith.sitofp %33 : vector<8x128xi32> to vector<8x128xf32>
    %c0_1 = arith.constant 0 : index
    %c0_2 = arith.constant 0 : index
    %35 = vector.load %arg2[%c0_1, %c0_2] : memref<128x128xf32, #tpu.memory_space<vmem>>, vector<128x128xf32>
    %cst = arith.constant dense<0.000000e+00> : vector<8x128xf32>
    %36 = tpu.matmul %34, %35, %cst {dimension_numbers = #tpu.dot_dimension_numbers<[1], [0], [0], [1], [0, 0, 1, 1], [], []>} : vector<8x128xf32>, vector<128x128xf32>, vector<8x128xf32> -> vector<8x128xf32>
    %c0_3 = arith.constant 0 : index
    %c0_4 = arith.constant 0 : index
    %37 = vector.load %arg3[%c0_3, %c0_4] : memref<8x128xf32, #tpu.memory_space<vmem>>, vector<8x128xf32>
    tpu.vector_store %arg3[%c0_3, %c0_4], %36 {strides = array<i32>} : memref<8x128xf32, #tpu.memory_space<vmem>>, vector<8x128xf32>,
    return
  }
  func.func @transform_0(%arg0: i32) -> (i32, i32) {
    %c0_i32 = arith.constant 0 : i32
    %c0_i32_0 = arith.constant 0 : i32
    return %arg0, %c0_i32 : i32, i32
  }
  func.func @transform_1(%arg0: i32) -> (i32, i32) {
    %c0_i32 = arith.constant 0 : i32
    %c0_i32_0 = arith.constant 0 : i32
    %c0_i32_1 = arith.constant 0 : i32
    return %c0_i32, %c0_i32_0 : i32, i32
  }
  func.func @transform_2(%arg0: i32) -> (i32, i32) {
    %c0_i32 = arith.constant 0 : i32
    %c0_i32_0 = arith.constant 0 : i32
    return %arg0, %c0_i32 : i32, i32
  }
}

</mosaic_0001>

<bundles_post_ra>
// kernel: tpu_custom_call.1
= control target key start
LH: loop header
LB: loop body
LE: loop exit
PB: predicated region body
PF: predicated region fallthrough
CT: control target
= control target key end

     0   :  { %7 = vsyncpa [#allocation3], 0  ;;  %s282_s0 = inlined_call_operand.hbm [shape: s32[8,8], index: 0, kind: input, shape index: {}]   ;;  %s283_s1 = inlined_call_operand.hbm [shape: f32[128,128], index: 1, kind: input, shape index: {}]   ;;  %s284_s2 = inlined_call_operand.hbm [shape: f32[8,128], index: 2, kind: output, shape index: {}]  }
   0x1   :  { %8 = vsyncpa [#allocation6], 0 }
   0x2   :  { %9 = vsyncpa [#allocation4], 0  ;;  %s15_s11 = sshll.u32 %s282_s0, 4  ;;  %s244_s12 = smov [#allocation2]   ;;  %s16_s11 = int_to_ptr.hbm [resolvable:$true] %s15_s11 }
   0x3   :  { %s17_s13 = sshll.u32 %s244_s12, 4  ;;  %s25_s16 = sshll.u32 %s283_s1, 4  ;;  %s18_s13 = int_to_ptr.vmem [resolvable:$true] %s17_s13  ;;  %s26_s16 = int_to_ptr.hbm [resolvable:$true] %s25_s16 }
   0x4   :  { %20 = dma.hbm_to_vmem [thread:$0]  %s16_s11, 128, %s18_s13, [#allocation3]  }
   0x5   :  { %s245_s17 = smov [#allocation5]   ;;  %s246_s19 = smov 128  }
   0x6   :  { %s27_s18 = sshll.u32 %s245_s17, 4  ;;  %s247_s20 = smov 8   ;;  %s28_s18 = int_to_ptr.vmem [resolvable:$true] %s27_s18 }
   0x7   :  { %33 = dma.hbm_to_vmem [thread:$0]  %s26_s16, 2048, %s28_s18, [#allocation6], %s246_s19, %s246_s19, %s247_s20  }
   0x8   :  { %238 = dma.done.wait [#allocation3], 128  }
   0x9   :  { %239 = vsyncadd [#allocation3], 4294967168 }
   0xa   :  { %240 = dma.done.wait [#allocation6], 2048  }
   0xb   :  { %241 = vsyncadd [#allocation6], 4294965248  ;;  %v248_v0 = vmov 2   ;;  %v249_v1 = vmov 0   ;;  %v250_v2 = vmov 4   ;;  %v42_v3 = vld [vmem:[#allocation2] sm:$0xff]  ;;  %v43_v28 = vlaneseq }
   0xc   :  { %159 = vset.pattern.permute.xlu1 %v248_v0  ;;  %157 = vset.pattern.permute.xlu0 %v249_v1  ;;  %v101_v4 = vld [vmem:[#allocation5 + $0x78] sm:$0xff]  ;;  %v251_v5 = vmov 3   ;;  %v252_v6 = vmov 1   ;;  %v253_v7 = vmov 5   ;;  %v254_v8 = vmov 6   ;;  %v100_v10 = vld [vmem:[#allocation5 + $0x70] sm:$0xff] }
   0xd   :  { %161 = vset.pattern.permute.xlu2 %v250_v2  ;;  %54 = vperm.xlu1 %159, %v42_v3   ;;  %v255_v9 = vmov 7   ;;  %v99_v11 = vld [vmem:[#allocation5 + $0x68] sm:$0xff]  ;;  %v98_v12 = vld [vmem:[#allocation5 + $0x60] sm:$0xff]  ;;  %v97_v13 = vld [vmem:[#allocation5 + $0x58] sm:$0xff]  ;;  %v44_v31 = vand.u32 127, %v43_v28  ;;  %v256_v35 = vmov 1.0  }
   0xe   :  { %46 = vperm.xlu0 %157, %v42_v3   ;;  %62 = vperm.xlu2 %161, %v42_v3   ;;  %v96_v14 = vld [vmem:[#allocation5 + $0x50] sm:$0xff]  ;;  %v95_v15 = vld [vmem:[#allocation5 + $0x48] sm:$0xff]  ;;  %v94_v16 = vld [vmem:[#allocation5 + $0x40] sm:$0xff]  ;;  %s257_s0 = smov [#allocation7]   ;;  %s130_s23 = sshll.u32 %s284_s2, 4  ;;  %s131_s23 = int_to_ptr.hbm [resolvable:$true] %s130_s23 }
   0xf   :  { %102 = vmatpush.msra.mxu0 %v101_v4  ;;  %v93_v17 = vld [vmem:[#allocation5 + $0x38] sm:$0xff]  ;;  %v92_v18 = vld [vmem:[#allocation5 + $0x30] sm:$0xff]  ;;  %v91_v19 = vld [vmem:[#allocation5 + $0x28] sm:$0xff]  ;;  %s128_s1 = sshll.u32 %s257_s0, 4  ;;  %s129_s1 = int_to_ptr.vmem [resolvable:$true] %s128_s1 }
  0x10   :  { %v90_v20 = vld [vmem:[#allocation5 + $0x20] sm:$0xff]  ;;  %v89_v21 = vld [vmem:[#allocation5 + $0x18] sm:$0xff]  ;;  %v88_v22 = vld [vmem:[#allocation5 + $0x10] sm:$0xff] }
  0x11   :  { %103 = vmatpush.msra.mxu0 %v100_v10  ;;  %v87_v23 = vld [vmem:[#allocation5 + $0x8] sm:$0xff]  ;;  %v86_v24 = vld [vmem:[#allocation5] sm:$0xff] }
  0x13   :  { %104 = vmatpush.msra.mxu0 %v99_v11 }
  0x15   :  { %160 = vset.pattern.permute.xlu1 %v251_v5  ;;  %105 = vmatpush.msra.mxu0 %v98_v12 }
  0x16   :  { %158 = vset.pattern.permute.xlu0 %v252_v6  ;;  %58 = vperm.xlu1 %160, %v42_v3  }
  0x17   :  { %50 = vperm.xlu0 %158, %v42_v3   ;;  %162 = vset.pattern.permute.xlu2 %v253_v7 }
  0x18   :  { %66 = vperm.xlu2 %162, %v42_v3   ;;  %106 = vmatpush.msra.mxu0 %v97_v13 }
  0x1a   :  { %107 = vmatpush.msra.mxu0 %v96_v14 }
  0x1c   :  { %108 = vmatpush.msra.mxu0 %v95_v15 }
  0x1e   :  { %163 = vset.pattern.permute.xlu1 %v254_v8  ;;  %109 = vmatpush.msra.mxu0 %v94_v16 }
  0x1f   :  { %165 = vset.pattern.permute.xlu0 %v255_v9  ;;  %70 = vperm.xlu1 %163, %v42_v3  }
  0x20   :  { %164 = vset.pattern.permute.xlu2 %v255_v9  ;;  %110 = vmatpush.msra.mxu0 %v93_v17 }
  0x21   :  { %74 = vperm.xlu2 %164, %v42_v3  }
  0x22   :  { %111 = vmatpush.msra.mxu0 %v92_v18 }
  0x24   :  { %112 = vmatpush.msra.mxu0 %v91_v19 }
  0x26   :  { %113 = vmatpush.msra.mxu0 %v90_v20 }
  0x28   :  { %114 = vmatpush.msra.mxu0 %v89_v21 }
  0x2a   :  { %115 = vmatpush.msra.mxu0 %v88_v22 }
  0x2c   :  { %116 = vmatpush.msra.mxu0 %v87_v23 }
  0x2e   :  { %117 = vmatpush.msra.mxu0 %v86_v24 }
  0x68   :  { %v63_v25 = vpop.permute.xlu2 %62 }
  0x69   :  { %vm64_vm4 = vcmp.eq.s32.totalorder %v63_v25, %v44_v31 }
  0x72   :  { %v67_v29 = vpop.permute.xlu2 %66 }
  0x73   :  { %vm68_vm5 = vcmp.eq.s32.totalorder %v67_v29, %v44_v31 }
  0x74   :  { %vm79_vm9 = vmor %vm64_vm4, %vm68_vm5 }
  0x7b   :  { %v75_v33 = vpop.permute.xlu2 %74 }
  0x7c   :  { %vm76_vm8 = vcmp.eq.s32.totalorder %v75_v33, %v44_v31 }
  0x7f   :  { %v55_v26 = vpop.permute.xlu1 %54 }
  0x80   :  { %v47_v27 = vpop.permute.xlu0 %46  ;;  %vm56_vm3 = vcmp.eq.s32.totalorder %v55_v26, %v44_v31 }
  0x81   :  { %vm48_vm1 = vcmp.eq.s32.totalorder %v47_v27, %v44_v31 }
  0x88   :  { %v59_v30 = vpop.permute.xlu1 %58 }
  0x89   :  { %v51_v32 = vpop.permute.xlu0 %50  ;;  %vm60_vm0 = vcmp.eq.s32.totalorder %v59_v30, %v44_v31 }
  0x8a   :  { %vm52_vm2 = vcmp.eq.s32.totalorder %v51_v32, %v44_v31  ;;  %vm78_vm6 = vmor %vm56_vm3, %vm60_vm0 }
  0x8b   :  { %vm77_vm7 = vmor %vm48_vm1, %vm52_vm2 }
  0x8c   :  { %vm81_vm10 = vmor %vm77_vm7, %vm78_vm6 }
  0x91   :  { %v71_v34 = vpop.permute.xlu1 %70 }
  0x92   :  { %vm72_vm11 = vcmp.eq.s32.totalorder %v71_v34, %v44_v31 }
  0x93   :  { %vm80_vm12 = vmor %vm72_vm11, %vm76_vm8 }
  0x94   :  { %vm82_vm13 = vmor %vm79_vm9, %vm80_vm12 }
  0x95   :  { %vm83_vm14 = vmor %vm81_vm10, %vm82_vm13 }
  0x96   :  { %142 = vmatmul.msk.f32.vlgmr.msra.gmra.mxu0 %vm83_vm14, %v256_v35 }
 0x113   :  { %v119_v36 = vpop.f32.mrf.mxu0 }
 0x114   :  { %122 = vst [vmem:[#allocation7] sm:$0xff] %v119_v36 }
 0x115   :  { %133 = dma.vmem_to_hbm [thread:$0]  %s129_s1, 128, %s131_s23, [#allocation4]  }
 0x116   :  { %242 = dma.done.wait [#allocation4], 128  }
 0x117   :  { %243 = vsyncadd [#allocation4], 4294967168 }
 0x118   :  { %138 = vsyncpa [#allocation3], 1 }
 0x119   :  { %139 = vsyncpa [#allocation6], 1 }
 0x11a   :  { %140 = vsyncpa [#allocation4], 1 }

</bundles_post_ra>
